<compile_context>
chip_gen: v6e
topology: v6e:2x2x1
jax: 0.10.0
libtpu: 0.0.40
codegen_flags: <defaults>
</compile_context>

<pallas_src>
import functools

import jax
import jax.numpy as jnp
from jax.experimental import pallas as pl
from jax.experimental.pallas import tpu as pltpu


# ----------------------------------------------------------------------------
# helpers
# ----------------------------------------------------------------------------
def _round_up(x: int, m: int) -> int:
    return (x + m - 1) // m * m


def _vmem_cap_bytes() -> int:
    """Generation-aware scoped-VMEM ceiling: ~3/4 of physical per-core VMEM,
    capped at 96 MiB (v5e/v6e have 128 MiB physical, v7x has 64 MiB/TC)."""
    try:
        phys = int(pltpu.get_tpu_info().vmem_capacity_bytes)
    except Exception:
        phys = 64 << 20  # conservative worst case (v7x per-TensorCore)
    return int(min(phys * 3 // 4, 96 << 20))


def _choose_tile_b(b: int, per_row_bytes: int, resident_bytes: int,
                   cap: int) -> int:
    """Batch tile: multiple of 16 (bf16 sublane packing), fits double-buffered
    in the VMEM budget net of the resident weight block, and — when the batch
    allows — small enough that grid_n >= 2 so the 'parallel' batch axis can
    actually split across both TensorCores on v7x."""
    budget = max(cap - 2 * resident_bytes, 4 << 20)
    tb = 1024
    while tb > 16 and 2 * tb * per_row_bytes > budget:
        tb //= 2
    b16 = _round_up(max(b, 1), 16)
    tb = min(tb, b16)
    if b16 > 16:                                   # allow >= 2 grid steps
        tb = min(tb, _round_up((b16 + 1) // 2, 16))
    return _round_up(tb, 16)


def _vmem_limit_bytes(tb: int, per_row_bytes: int, resident_bytes: int,
                      cap: int) -> int:
    # double-buffered tiles + double-buffered resident W/bias + headroom
    need = 2 * tb * per_row_bytes + 2 * resident_bytes + (1 << 20)
    return int(min(max(2 * need, 8 << 20), cap))


# ----------------------------------------------------------------------------
# kernels
# ----------------------------------------------------------------------------
def _train_step_kernel(x_ref, w_ref, b_ref, t_ref, psum_ref, *,
                       tile_b, n_valid_rows):
    """SSE-only: no pred output, all operands at native D_act lane width."""
    # Policy head: [TB, D_in]bf16 @ [D_in, D_act]bf16 -> f32 accumulate (MXU).
    pred = jnp.dot(x_ref[...], w_ref[...], preferred_element_type=jnp.float32)
    pred = pred + b_ref[...]

    # Metric hot path: squared error vs. ground-truth action (unpadded lanes).
    diff = pred - t_ref[...]
    if n_valid_rows % tile_b != 0:
        # Mask batch-padding rows (padded obs rows would contribute bias-gt).
        row = (jax.lax.broadcasted_iota(jnp.int32, diff.shape, 0)
               + pl.program_id(0) * tile_b)
        diff = jnp.where(row < n_valid_rows, diff, 0.0)
    # Per-tile, per-lane partial sums: sublane-only reduce, tiny store.
    psum_ref[...] = jnp.sum(diff * diff, axis=0, keepdims=True)[None]


def _predict_kernel(x_ref, w_ref, b_ref, pred_ref):
    """Prediction-only: lane-dense (128-wide) f32 pred writeback."""
    pred = jnp.dot(x_ref[...], w_ref[...], preferred_element_type=jnp.float32)
    pred_ref[...] = (pred + b_ref[...]).astype(pred_ref.dtype)


# ----------------------------------------------------------------------------
# wrappers
# ----------------------------------------------------------------------------
def _run_train_kernel(obs, w, b, gt):
    """Returns (sse, n_elements). No pred HBM writeback, no lane padding."""
    B, D_in = obs.shape
    D_act = w.shape[1]
    cap = _vmem_cap_bytes()
    per_row = 2 * D_in + 4 * D_act              # obs bf16 in + gt f32 in
    resident = 2 * D_in * D_act + 4 * D_act     # W bf16 + bias f32
    TB = _choose_tile_b(B, per_row, resident, cap)
    B_pad = _round_up(B, TB)
    grid_n = B_pad // TB

    # cast-then-pad: padded intermediates stay at 2 B/elem
    obs_p = jnp.pad(obs.astype(jnp.bfloat16), ((0, B_pad - B), (0, 0)))
    gt_p = jnp.pad(gt.astype(jnp.float32), ((0, B_pad - B), (0, 0)))
    w_b = w.astype(jnp.bfloat16)
    b_f = jnp.asarray(b, jnp.float32).reshape(1, D_act)

    kernel = functools.partial(_train_step_kernel, tile_b=TB, n_valid_rows=B)
    cost = pl.CostEstimate(
        flops=2 * B_pad * D_in * D_act + 4 * B_pad * D_act,
        transcendentals=0,
        bytes_accessed=(obs_p.size * 2 + w_b.size * 2 + b_f.size * 4
                        + gt_p.size * 4 + grid_n * D_act * 4),
    )

    psums = pl.pallas_call(
        kernel,
        out_shape=jax.ShapeDtypeStruct((grid_n, 1, D_act), jnp.float32),
        grid_spec=pltpu.PrefetchScalarGridSpec(
            num_scalar_prefetch=0,
            grid=(grid_n,),
            in_specs=[
                pl.BlockSpec((TB, D_in), lambda i: (i, 0)),      # obs tile
                pl.BlockSpec((D_in, D_act), lambda i: (0, 0)),   # W (resident)
                pl.BlockSpec((1, D_act), lambda i: (0, 0)),      # bias
                pl.BlockSpec((TB, D_act), lambda i: (i, 0)),     # gt (unpadded)
            ],
            out_specs=pl.BlockSpec((1, 1, D_act), lambda i: (i, 0, 0)),
        ),
        compiler_params=pltpu.CompilerParams(
            dimension_semantics=("parallel",),
            vmem_limit_bytes=_vmem_limit_bytes(TB, per_row, resident, cap),
        ),
        cost_estimate=cost,
    )(obs_p, w_b, b_f, gt_p)

    sse = jnp.sum(psums)    # tiny (grid_n, 1, D_act) final reduce in XLA
    return sse, B * D_act


def _run_predict_kernel(obs, w, b):
    B, D_in = obs.shape
    D_act = w.shape[1]
    D_pad = _round_up(D_act, 128)               # lane-dense pred slab
    cap = _vmem_cap_bytes()
    per_row = 2 * D_in + 4 * D_pad              # obs bf16 in + pred f32 out
    resident = 2 * D_in * D_pad + 4 * D_pad     # W bf16 + bias f32
    TB = _choose_tile_b(B, per_row, resident, cap)
    B_pad = _round_up(B, TB)
    grid_n = B_pad // TB

    obs_p = jnp.pad(obs.astype(jnp.bfloat16), ((0, B_pad - B), (0, 0)))
    w_p = jnp.pad(w.astype(jnp.bfloat16), ((0, 0), (0, D_pad - D_act)))
    b_p = jnp.pad(jnp.asarray(b, jnp.float32).reshape(1, D_act),
                  ((0, 0), (0, D_pad - D_act)))

    cost = pl.CostEstimate(
        flops=2 * B_pad * D_in * D_pad + B_pad * D_pad,
        transcendentals=0,
        bytes_accessed=(obs_p.size * 2 + w_p.size * 2 + b_p.size * 4
                        + B_pad * D_pad * 4),
    )

    pred_p = pl.pallas_call(
        _predict_kernel,
        out_shape=jax.ShapeDtypeStruct((B_pad, D_pad), jnp.float32),
        grid_spec=pltpu.PrefetchScalarGridSpec(
            num_scalar_prefetch=0,
            grid=(grid_n,),
            in_specs=[
                pl.BlockSpec((TB, D_in), lambda i: (i, 0)),
                pl.BlockSpec((D_in, D_pad), lambda i: (0, 0)),
                pl.BlockSpec((1, D_pad), lambda i: (0, 0)),
            ],
            out_specs=pl.BlockSpec((TB, D_pad), lambda i: (i, 0)),
        ),
        compiler_params=pltpu.CompilerParams(
            dimension_semantics=("parallel",),
            vmem_limit_bytes=_vmem_limit_bytes(TB, per_row, resident, cap),
        ),
        cost_estimate=cost,
    )(obs_p, w_p, b_p)

    return pred_p[:B, :D_act]


# ----------------------------------------------------------------------------
# BaseAgent mirror
# ----------------------------------------------------------------------------
class PallasBaseAgent:
    """JAX/Pallas mirror of BaseAgent's forward-dispatch semantics."""

    def __init__(self, d_in: int, d_act: int, key):
        kw, kb = jax.random.split(key)
        self.w = jax.random.normal(kw, (d_in, d_act), jnp.float32) * 0.02
        self.b = jax.random.normal(kb, (1, d_act), jnp.float32) * 0.02
        self.metric = {}

    # --- BaseAgent API ------------------------------------------------------
    def reset(self):
        self.metric = {}

    def forward(self, agent_mode: str, *args, **kwargs):
        self.reset()
        if agent_mode == "train":
            return self.train_step(*args, **kwargs)
        elif agent_mode == "validate":
            return self.validate_step(*args, **kwargs)
        elif agent_mode == "eval":
            return self.eval_step(*args, **kwargs)
        else:
            raise NotImplementedError

    __call__ = forward

    # --- concrete steps (the abstract methods, minimally instantiated) ------
    def train_step(self, batch: dict):
        obs, gt = batch["obs"], batch["action"]
        sse, n_elem = _run_train_kernel(obs, self.w, self.b, gt)
        self.metric = {"mse_loss": sse / jnp.float32(n_elem)}
        return self.metric

    def validate_step(self, *a, **k):
        # @torch.no_grad() equivalent: no gradient trace is built here anyway.
        return self.train_step(*a, **k)

    def eval_step(self, batch: dict, *, compare_gt: bool = False):
        obs = batch["obs"]
        # Predictions always come from the lane-dense prediction-only kernel.
        pred = _run_predict_kernel(obs, self.w, self.b)
        if compare_gt:
            sse, n_elem = _run_train_kernel(obs, self.w, self.b, batch["action"])
            self.metric = {"mse_loss": sse / jnp.float32(n_elem)}
        else:
            self.metric = {}
        return self.metric, pred


# ----------------------------------------------------------------------------
# self-test
# ----------------------------------------------------------------------------
if __name__ == "__main__":
    B, D_IN, D_ACT = 8, 32, 8
    key = jax.random.PRNGKey(0)
    k_obs, k_act, k_par, k_obs2, k_act2, k_obs3, k_act3 = jax.random.split(key, 7)

    batch = {
        "obs": jax.random.normal(k_obs, (B, D_IN), jnp.float32),
        "action": jax.random.normal(k_act, (B, D_ACT), jnp.float32),
    }

    agent = PallasBaseAgent(D_IN, D_ACT, k_par)

    # reference (same bf16 inputs / f32 accumulate as the kernels)
    def ref_forward(obs):
        return jnp.dot(obs.astype(jnp.bfloat16), agent.w.astype(jnp.bfloat16),
                       preferred_element_type=jnp.float32) + agent.b

    # train mode
    metric_train = agent("train", batch)
    jax.block_until_ready(metric_train["mse_loss"])

    # validate mode (routes through train_step)
    metric_val = agent("validate", batch)
    jax.block_until_ready(metric_val["mse_loss"])

    # eval mode with ground truth
    metric_eval, pred = agent("eval", batch, compare_gt=True)
    jax.block_until_ready(pred)

    # eval mode without ground truth (prediction-only path)
    metric_nogt, pred_nogt = agent("eval", batch, compare_gt=False)
    jax.block_until_ready(pred_nogt)
    assert metric_nogt == {}

    ref_pred = ref_forward(batch["obs"])
    ref_mse = jnp.mean((ref_pred - batch["action"]) ** 2)
    assert jnp.allclose(pred, ref_pred, atol=1e-4, rtol=1e-3)
    assert jnp.allclose(pred_nogt, ref_pred, atol=1e-4, rtol=1e-3)
    assert jnp.allclose(metric_train["mse_loss"], ref_mse, atol=1e-4, rtol=1e-3)
    assert jnp.allclose(metric_eval["mse_loss"], ref_mse, atol=1e-4, rtol=1e-3)

    # ragged batch (exercises the padded-row mask inside the SSE kernel)
    B2 = 10
    batch2 = {
        "obs": jax.random.normal(k_obs2, (B2, D_IN), jnp.float32),
        "action": jax.random.normal(k_act2, (B2, D_ACT), jnp.float32),
    }
    metric2 = agent("train", batch2)
    jax.block_until_ready(metric2["mse_loss"])
    ref_pred2 = ref_forward(batch2["obs"])
    ref_mse2 = jnp.mean((ref_pred2 - batch2["action"]) ** 2)
    assert jnp.allclose(metric2["mse_loss"], ref_mse2, atol=1e-4, rtol=1e-3)

    # multi-tile batch (exercises grid_n >= 2 + masking on the last tile)
    B3 = 40
    batch3 = {
        "obs": jax.random.normal(k_obs3, (B3, D_IN), jnp.float32),
        "action": jax.random.normal(k_act3, (B3, D_ACT), jnp.float32),
    }
    metric3 = agent("train", batch3)
    jax.block_until_ready(metric3["mse_loss"])
    ref_pred3 = ref_forward(batch3["obs"])
    ref_mse3 = jnp.mean((ref_pred3 - batch3["action"]) ** 2)
    assert jnp.allclose(metric3["mse_loss"], ref_mse3, atol=1e-4, rtol=1e-3)
    _, pred3 = agent("eval", batch3, compare_gt=True)
    jax.block_until_ready(pred3)
    assert jnp.allclose(pred3, ref_pred3, atol=1e-4, rtol=1e-3)

    print("KERNEL_OK")
</pallas_src>

<mosaic_0001>
module attributes {stable_mosaic.version = 11 : i64} {
  func.func @_train_step_kernel(%arg0: i32, %arg1: memref<16x32xbf16, #tpu.memory_space<vmem>>, %arg2: memref<32x8xbf16, #tpu.memory_space<vmem>>, %arg3: memref<1x8xf32, #tpu.memory_space<vmem>>, %arg4: memref<16x8xf32, #tpu.memory_space<vmem>>, %arg5: memref<1x1x8xf32, #tpu.memory_space<vmem>>) attributes {dimension_semantics = [#tpu.dimension_semantics<parallel>], iteration_bounds = array<i64: 1>, scalar_prefetch = 0 : i64, scratch_operands = 0 : i64, tpu.core_type = #tpu.core_type<tc>, window_params = [{transform_indices = @transform_0, window_bounds = array<i64: 16, 32>}, {pipeline_mode = #tpu.pipeline_mode<synchronous>, transform_indices = @transform_1, window_bounds = array<i64: 32, 8>}, {pipeline_mode = #tpu.pipeline_mode<synchronous>, transform_indices = @transform_2, window_bounds = array<i64: 1, 8>}, {transform_indices = @transform_3, window_bounds = array<i64: 16, 8>}, {transform_indices = @transform_4, window_bounds = array<i64: 1, 1, 8>}]} {
    %c0 = arith.constant 0 : index
    %c0_0 = arith.constant 0 : index
    %0 = vector.load %arg1[%c0, %c0_0] : memref<16x32xbf16, #tpu.memory_space<vmem>>, vector<16x32xbf16>
    %c0_1 = arith.constant 0 : index
    %c0_2 = arith.constant 0 : index
    %1 = vector.load %arg2[%c0_1, %c0_2] : memref<32x8xbf16, #tpu.memory_space<vmem>>, vector<32x8xbf16>
    %cst = arith.constant dense<0.000000e+00> : vector<16x8xf32>
    %2 = tpu.matmul %0, %1, %cst {dimension_numbers = #tpu.dot_dimension_numbers<[1], [0], [0], [1], [0, 0, 1, 1], [], []>} : vector<16x32xbf16>, vector<32x8xbf16>, vector<16x8xf32> -> vector<16x8xf32>
    %c0_3 = arith.constant 0 : index
    %c0_4 = arith.constant 0 : index
    %3 = vector.load %arg3[%c0_3, %c0_4] : memref<1x8xf32, #tpu.memory_space<vmem>>, vector<1x8xf32>
    %4 = vector.broadcast %3 : vector<1x8xf32> to vector<16x8xf32>
    %5 = arith.addf %2, %4 : vector<16x8xf32>
    %c0_5 = arith.constant 0 : index
    %c0_6 = arith.constant 0 : index
    %6 = vector.load %arg4[%c0_5, %c0_6] : memref<16x8xf32, #tpu.memory_space<vmem>>, vector<16x8xf32>
    %7 = arith.subf %5, %6 : vector<16x8xf32>
    %8 = tpu.iota {dimensions = array<i32: 0>} : vector<16x8xi32>
    %c16_i32 = arith.constant 16 : i32
    %9 = arith.muli %arg0, %c16_i32 : i32
    %10 = vector.broadcast %9 : i32 to vector<16x8xi32>
    %11 = arith.addi %8, %10 : vector<16x8xi32>
    %c8_i32 = arith.constant 8 : i32
    %12 = vector.broadcast %c8_i32 : i32 to vector<16x8xi32>
    %13 = arith.cmpi slt, %11, %12 : vector<16x8xi32>
    %cst_7 = arith.constant 0.000000e+00 : f32
    %14 = vector.broadcast %cst_7 : f32 to vector<16x8xf32>
    %15 = arith.select %13, %7, %14 : vector<16x8xi1>, vector<16x8xf32>
    %16 = arith.mulf %15, %15 : vector<16x8xf32>
    %cst_8 = arith.constant dense<0.000000e+00> : vector<8xf32>
    %17 = vector.multi_reduction <add>, %16, %cst_8 [0] : vector<16x8xf32> to vector<8xf32>
    %18 = vector.shape_cast %17 : vector<8xf32> to vector<1x8xf32>
    %19 = vector.shape_cast %18 : vector<1x8xf32> to vector<1x1x8xf32>
    %c0_9 = arith.constant 0 : index
    %c0_10 = arith.constant 0 : index
    %c0_11 = arith.constant 0 : index
    %20 = vector.load %arg5[%c0_9, %c0_10, %c0_11] : memref<1x1x8xf32, #tpu.memory_space<vmem>>, vector<1x1x8xf32>
    tpu.vector_store %arg5[%c0_9, %c0_10, %c0_11], %19 {strides = array<i32>} : memref<1x1x8xf32, #tpu.memory_space<vmem>>, vector<1x1x8xf32>,
    return
  }
  func.func @transform_0(%arg0: i32) -> (i32, i32) {
    %c0_i32 = arith.constant 0 : i32
    %c0_i32_0 = arith.constant 0 : i32
    return %arg0, %c0_i32 : i32, i32
  }
  func.func @transform_1(%arg0: i32) -> (i32, i32) {
    %c0_i32 = arith.constant 0 : i32
    %c0_i32_0 = arith.constant 0 : i32
    %c0_i32_1 = arith.constant 0 : i32
    return %c0_i32, %c0_i32_0 : i32, i32
  }
  func.func @transform_2(%arg0: i32) -> (i32, i32) {
    %c0_i32 = arith.constant 0 : i32
    %c0_i32_0 = arith.constant 0 : i32
    %c0_i32_1 = arith.constant 0 : i32
    return %c0_i32, %c0_i32_0 : i32, i32
  }
  func.func @transform_3(%arg0: i32) -> (i32, i32) {
    %c0_i32 = arith.constant 0 : i32
    %c0_i32_0 = arith.constant 0 : i32
    return %arg0, %c0_i32 : i32, i32
  }
  func.func @transform_4(%arg0: i32) -> (i32, i32, i32) {
    %c0_i32 = arith.constant 0 : i32
    %c0_i32_0 = arith.constant 0 : i32
    %c0_i32_1 = arith.constant 0 : i32
    return %arg0, %c0_i32, %c0_i32_0 : i32, i32, i32
  }
}

</mosaic_0001>

<bundles_post_ra>
// kernel: tpu_custom_call.1
= control target key start
LH: loop header
LB: loop body
LE: loop exit
PB: predicated region body
PF: predicated region fallthrough
CT: control target
= control target key end

     0   :  { %v181_v1 = vmov 0.0   ;;  %vm182_vm0 = vmmov 0   ;;  %s227_s0 = inlined_call_operand.vmem [shape: bf16[16,32], index: 0, kind: input, shape index: {}]   ;;  %s228_s1 = inlined_call_operand.vmem [shape: bf16[32,8], index: 1, kind: input, shape index: {}]   ;;  %s229_s2 = inlined_call_operand.vmem [shape: f32[1,8], index: 2, kind: input, shape index: {}]   ;;  %s230_s3 = inlined_call_operand.vmem [shape: f32[16,8], index: 3, kind: input, shape index: {}]   ;;  %s231_s4 = inlined_call_operand.hbm [shape: f32[1,1,8], index: 4, kind: output, shape index: {}]  }
   0x1   :  { %v156_v0 = vld [vmem:[%s228_s1 + $0x8] sm:$0xff]   ;;  %145 = vmatprep.subr.bf16.mxu0 %v181_v1  ;;  %v157_v2 = vld [vmem:[%s228_s1] sm:$0xff]   ;;  %149 = vmatprep.mubr.msk.bf16.mxu0 %vm182_vm0, %v181_v1 }
   0x2   :  { %146 = vmatpush3.bf16.msra.mxu0 %v156_v0 }
   0x3   :  { %147 = vmatprep.subr.bf16.mxu0 %v181_v1 }
   0x4   :  { %9 = vsyncpa [#allocation3], 0  ;;  %v158_v3 = vld [vmem:[%s227_s0] sm:$0xff]   ;;  %vm49_vm1 = vcmask 261120   ;;  %vm111_vm2 = vcmask 64512   ;;  %s183_s0 = smov [#allocation2]  }
   0x5   :  { %v137_v4 = vld [vmem:[%s229_s2] ss:$0 sm:$0xff]  ;;  %s129_s1 = sshll.u32 %s183_s0, 4  ;;  %vm121_vm3 = vcmask 57344   ;;  %s130_s1 = int_to_ptr.vmem [resolvable:$true] %s129_s1 }
   0x6   :  { %148 = vmatpush3.bf16.msra.mxu0 %v157_v2  ;;  %v94_v6 = vld [vmem:[%s230_s3] sm:$0xff]  ;;  %s159_s2 = scalar_lea.vmem %s130_s1, 16  ;;  %s163_s3 = scalar_lea.vmem %s130_s1, 32 }
   0x7   :  { %p160_p0 = scmp.ne.s32.totalorder %s130_s1, %s159_s2  ;;  %p164_p1 = scmp.lt.s32.totalorder %s130_s1, %s130_s1 }
   0x8   :  { %p165_p2 = scmp.lt.s32.totalorder %s163_s3, %s159_s2 }
   0x9   :  { %150 = vmatmul.mubr.msk.bf16.vlgmr.msra.gmra.mxu0 %vm49_vm1, %v158_v3 }
   0xa   :  { %p166_p3 = por %p165_p2, %p164_p1 }
   0xc   :  { %p167_p4 = pnand %p166_p3, %p160_p0 }
  0xc9   :  { %v87_v5 = vpop.f32.mrf.mxu0 }
  0xca   :  { %v88_v7 = vadd.f32 %v137_v4, %v87_v5 }
  0xcb   :  { %v151_v8 = vpop.f32.mrf.mxu0 }
  0xcc   :  { %v96_v9 = vsub.f32 %v88_v7, %v94_v6 }
  0xcd   :  { %v90_v10 = vpop.f32.mrf.mxu0 }
  0xce   :  { %v109_v11 = vmul.f32 %v96_v9, %v96_v9 }
  0xcf   :  { %v152_v12 = vpop.f32.mrf.mxu0 }
  0xd0   :  { %v112_v13 = vsel %vm111_vm2, %v109_v11, 0.0 }
  0xd1   :  { %v115_v14 = vrot.slane %v112_v13, 4 }
  0xd3   :  { %v116_v15 = vadd.f32 %v115_v14, %v112_v13 }
  0xd5   :  { %v117_v16 = vrot.slane %v116_v15, 2 }
  0xd7   :  { %v118_v17 = vadd.f32 %v117_v16, %v116_v15 }
  0xd9   :  { %v119_v18 = vrot.slane %v118_v17, 1 }
  0xdb   :  { %v120_v19 = vadd.f32 %v119_v18, %v118_v17 }
  0xdd   :  { %122 = vst.msk [vmem:[#allocation2] sm:$0x1] %vm121_vm3, %v120_v19 }
  0xde   :  { %170 = shalt.err (!%p167_p4)
}
  0xdf   :  { %132 = dma.vmem_to_hbm [thread:$0]  %s130_s1, 16, %s231_s4, [#allocation3]  }
  0xe0   :  { %179 = dma.done.wait [#allocation3], 16  }
  0xe1   :  { %180 = vsyncadd [#allocation3], 4294967280 }
  0xe2   :  { %136 = vsyncpa [#allocation3], 1 }

</bundles_post_ra>
